<compile_context>
chip_gen: v7x
topology: tpu7x:2x2x1
jax: 0.10.0
libtpu: 0.0.40
codegen_flags: <defaults>
</compile_context>

<pallas_src>
import jax
import jax.numpy as jnp
from jax.experimental import pallas as pl
from jax.experimental.pallas import tpu as pltpu

LANES = 128
_TARGET_BLOCK_BYTES = 2 * 1024 * 1024  # ~2 MiB per block; (in+out) * double-buffer = 8 MiB.


def _quantize_kernel(params_ref, x_ref, o_ref):
    # params_ref (SMEM, f32[4]) = [scale, bias, lower_bound, upper_bound]
    scale = params_ref[0]
    bias = params_ref[1]
    lo = params_ref[2]
    hi = params_ref[3]
    x = x_ref[...].astype(jnp.float32)
    q = jnp.clip(jnp.round(x * scale) + bias, lo, hi)
    o_ref[...] = q.astype(o_ref.dtype)


def _sublane_pack(dtype) -> int:
    # Rows per native vreg tile: 8 for 4-byte, 16 for 2-byte, 32 for 1-byte dtypes.
    return 8 * max(1, 4 // jnp.dtype(dtype).itemsize)


def pallas_quantize(x, scale, bias, lower_bound, upper_bound):
    """Elementwise fake-int quantization of `x` (any shape), streamed through VMEM."""
    orig_shape = x.shape
    dtype = x.dtype
    n = int(x.size)

    flat = x.reshape(-1)  # native dtype kept; reshape of contiguous data is free

    # Widest lane-dense column width that divides n exactly (pure reshape, no pad).
    cols = None
    for cand in (2048, 1024, 512, 256, 128):
        if n % cand == 0:
            cols = cand
            break
    padded = False
    if cols is None:
        # Fallback for awkward sizes: pad only up to the next multiple of 128 lanes.
        cols = LANES
        rows = pl.cdiv(n, cols)
        flat = jnp.pad(flat, (0, rows * cols - n))
        padded = True
    rows = flat.shape[0] // cols
    slab = flat.reshape(rows, cols)

    # Row-tile size: ~2 MiB blocks, rounded to the sublane pack for this dtype.
    pack = _sublane_pack(dtype)
    itemsize = jnp.dtype(dtype).itemsize
    tr = max(pack, (_TARGET_BLOCK_BYTES // (cols * itemsize)) // pack * pack)
    if tr >= rows:
        tr = rows  # single full-extent block along rows
    grid = (pl.cdiv(rows, tr),)

    params = jnp.array([scale, bias, lower_bound, upper_bound], dtype=jnp.float32)

    out_slab = pl.pallas_call(
        _quantize_kernel,
        out_shape=jax.ShapeDtypeStruct((rows, cols), dtype),
        grid_spec=pltpu.PrefetchScalarGridSpec(
            num_scalar_prefetch=1,
            grid=grid,
            in_specs=[pl.BlockSpec((tr, cols), lambda i, p_ref: (i, 0))],
            out_specs=pl.BlockSpec((tr, cols), lambda i, p_ref: (i, 0)),
        ),
        compiler_params=pltpu.CompilerParams(
            dimension_semantics=("parallel",),  # shard row-grid across TCs (v7x megacore)
        ),
    )(params, slab)

    out = out_slab.reshape(-1)
    if padded:
        out = out[:n]
    return out.reshape(orig_shape)


class QuantizerJAX:
    """JAX mirror of nzip Quantizer with pre-calibrated min/max."""
    # TODO(synk): the torch calibrate() contextmanager / Analyzer stats tracking is
    # stateful host-side glue; min/max are supplied directly here instead.

    def __init__(self, bits: int, symmetric: bool, vmin: float, vmax: float):
        self.bits = bits
        self.symmetric = symmetric
        self.min = jnp.asarray(vmin, jnp.float32)
        self.max = jnp.asarray(vmax, jnp.float32)

    @property
    def upper_bound(self):
        return 2 ** (self.bits - 1) - 1

    @property
    def lower_bound(self):
        return -(2 ** (self.bits - 1)) + 1 if self.symmetric else -(2 ** (self.bits - 1))

    @property
    def scale(self):
        if self.symmetric:
            return self.upper_bound / self.max
        # NOTE: same hazard as the torch original if max == min (inf scale).
        return (2 ** self.bits - 1) / (self.max - self.min)

    @property
    def bias(self):
        if self.symmetric:
            return jnp.asarray(0.0, jnp.float32)  # None in torch -> no shift
        return -jnp.round(self.min * self.scale) - 2 ** (self.bits - 1)

    def __call__(self, x):
        return pallas_quantize(
            x,
            self.scale,
            self.bias,
            float(self.lower_bound),
            float(self.upper_bound),
        )


def _reference_quantize(x, scale, bias, lo, hi):
    q = jnp.clip(jnp.round(x.astype(jnp.float32) * scale) + bias, lo, hi)
    return q.astype(x.dtype)


if __name__ == "__main__":
    key = jax.random.PRNGKey(0)
    # Small NCHW activation, as a conv-style input would be.
    x_f32 = jax.random.normal(key, (2, 4, 16, 16), dtype=jnp.float32) * 3.0
    x_bf16 = x_f32.astype(jnp.bfloat16)
    # Awkward-sized tensor to exercise the tail-pad fallback path.
    x_odd = jax.random.normal(jax.random.PRNGKey(1), (3, 5, 7), dtype=jnp.float32)
    # Larger activation to exercise the multi-block row grid.
    x_big = jax.random.normal(jax.random.PRNGKey(2), (8, 128, 1024), dtype=jnp.float32)

    bits = 8
    ok = True

    for x in (x_f32, x_bf16, x_odd, x_big):
        # "Calibration": min/max stats gathered from the tensor (glue JAX, matching
        # Analyzer.stats.min/max captured under calibrate()).
        xf = x.astype(jnp.float32)
        vmin = float(jnp.min(xf))
        vmax = float(jnp.max(xf))
        vabs = max(abs(vmin), abs(vmax))

        for symmetric in (True, False):
            q = QuantizerJAX(
                bits, symmetric,
                vmin,
                vabs if symmetric else vmax,
            )
            out = jax.block_until_ready(q(x))
            ref = _reference_quantize(
                x, q.scale, q.bias, float(q.lower_bound), float(q.upper_bound)
            )
            ok = ok and bool(
                jnp.allclose(out.astype(jnp.float32), ref.astype(jnp.float32), atol=1e-5)
            )
            ok = ok and out.dtype == x.dtype and out.shape == x.shape

    if ok:
        print("KERNEL_OK")
    else:
        print("MISMATCH")
</pallas_src>

<mosaic_0001>
module attributes {stable_mosaic.version = 11 : i64} {
  func.func @_quantize_kernel(%arg0: i32, %arg1: memref<4xf32, #tpu.memory_space<smem>>, %arg2: memref<1x2048xf32, #tpu.memory_space<vmem>>, %arg3: memref<1x2048xf32, #tpu.memory_space<vmem>>) attributes {dimension_semantics = [#tpu.dimension_semantics<parallel>], iteration_bounds = array<i64: 1>, scalar_prefetch = 1 : i64, scratch_operands = 0 : i64, tpu.core_type = #tpu.core_type<tc>, window_params = [{transform_indices = @transform_0, window_bounds = array<i64: 1, 2048>}, {transform_indices = @transform_1, window_bounds = array<i64: 1, 2048>}]} {
    %c0 = arith.constant 0 : index
    %0 = memref.load %arg1[%c0] : memref<4xf32, #tpu.memory_space<smem>>
    %c1 = arith.constant 1 : index
    %1 = memref.load %arg1[%c1] : memref<4xf32, #tpu.memory_space<smem>>
    %c2 = arith.constant 2 : index
    %2 = memref.load %arg1[%c2] : memref<4xf32, #tpu.memory_space<smem>>
    %c3 = arith.constant 3 : index
    %3 = memref.load %arg1[%c3] : memref<4xf32, #tpu.memory_space<smem>>
    %c0_0 = arith.constant 0 : index
    %c0_1 = arith.constant 0 : index
    %4 = vector.load %arg2[%c0_0, %c0_1] : memref<1x2048xf32, #tpu.memory_space<vmem>>, vector<1x2048xf32>
    %5 = vector.broadcast %0 : f32 to vector<1x2048xf32>
    %6 = arith.mulf %4, %5 : vector<1x2048xf32>
    %7 = math.roundeven %6 : vector<1x2048xf32>
    %8 = vector.broadcast %1 : f32 to vector<1x2048xf32>
    %9 = arith.addf %7, %8 : vector<1x2048xf32>
    %10 = vector.broadcast %2 : f32 to vector<1x2048xf32>
    %11 = arith.maximumf %10, %9 : vector<1x2048xf32>
    %12 = vector.broadcast %3 : f32 to vector<1x2048xf32>
    %13 = arith.minimumf %12, %11 : vector<1x2048xf32>
    %c0_2 = arith.constant 0 : index
    %c0_3 = arith.constant 0 : index
    %14 = vector.load %arg3[%c0_2, %c0_3] : memref<1x2048xf32, #tpu.memory_space<vmem>>, vector<1x2048xf32>
    tpu.vector_store %arg3[%c0_2, %c0_3], %13 {strides = array<i32>} : memref<1x2048xf32, #tpu.memory_space<vmem>>, vector<1x2048xf32>,
    return
  }
  func.func @transform_0(%arg0: i32, %arg1: memref<4xf32, #tpu.memory_space<smem>>) -> (i32, i32) {
    %c0_i32 = arith.constant 0 : i32
    %c0_i32_0 = arith.constant 0 : i32
    return %arg0, %c0_i32 : i32, i32
  }
  func.func @transform_1(%arg0: i32, %arg1: memref<4xf32, #tpu.memory_space<smem>>) -> (i32, i32) {
    %c0_i32 = arith.constant 0 : i32
    %c0_i32_0 = arith.constant 0 : i32
    return %arg0, %c0_i32 : i32, i32
  }
}

</mosaic_0001>

<bundles_post_ra>
// kernel: tpu_custom_call.1
= control target key start
LH: loop header
LB: loop body
LE: loop exit
PB: predicated region body
PF: predicated region fallthrough
CT: control target
= control target key end

     0   :  { %s185_s0 = inlined_call_operand.hbm [shape: f32[4], index: 0, kind: input, shape index: {}]   ;;  %s186_s1 = inlined_call_operand.hbm [shape: f32[1,2048], index: 1, kind: input, shape index: {}]   ;;  %s187_s2 = inlined_call_operand.hbm [shape: f32[1,2048], index: 2, kind: output, shape index: {}]  }
   0x1   :  { %s71_s11 = scalar_lea.hbm %s185_s0, 16 }
   0x2   :  { %p72_p0 = scmp.ne.s32.totalorder %s185_s0, %s71_s11  ;;  %p75_p1 = scmp.lt.u32.totalorder %s71_s11, %s185_s0 }
   0x4   :  { %p77_p2 = pnand %p75_p1, %p72_p0 }
   0x6   :  { %80 = shalt.err (!%p77_p2)  }
   0x7   :  { %s131_s16 = smov [#allocation3]  }
   0x8   :  { %8 = dma.hbm_to_smem %s185_s0, 16, %s131_s16, [#allocation2] }
   0x9   :  { %125 = dma.done.wait [#allocation2], 16 }
   0xa   :  { %126 = vsyncadd [#allocation2], 4294967280 }
   0xb   :  { %10 = sfence }
   0xc   :  { %11 = vsyncpa [#allocation5], 0 }
   0xd   :  { %12 = vsyncpa [#allocation6], 0  ;;  %s132_s19 = smov [#allocation4]   ;;  %s81_s23 = scalar_lea.hbm %s186_s1, 256 }
   0xe   :  { %s19_s20 = sshll.u32 %s132_s19, 4  ;;  %p82_p3 = scmp.ne.s32.totalorder %s186_s1, %s81_s23  ;;  %s20_s20 = int_to_ptr.vmem [resolvable:$true] %s19_s20 }
   0xf   :  { %p85_p4 = scmp.lt.u32.totalorder %s81_s23, %s186_s1 }
  0x11   :  { %p87_p5 = pnand %p85_p4, %p82_p3 }
  0x13   :  { %90 = shalt.err (!%p87_p5)
}
  0x14   :  { %s91_s0 = scalar_lea.vmem %s20_s20, 256  ;;  %p96_p7 = scmp.lt.s32.totalorder %s20_s20, %s20_s20 }
  0x15   :  { %p92_p6 = scmp.ne.s32.totalorder %s20_s20, %s91_s0  ;;  %p97_p8 = scmp.lt.s32.totalorder %s91_s0, %s91_s0 }
  0x17   :  { %p98_p9 = por %p97_p8, %p96_p7 }
  0x19   :  { %p99_p10 = pnand %p98_p9, %p92_p6 }
  0x1b   :  { %102 = shalt.err (!%p99_p10)
}
  0x1c   :  { %22 = dma.hbm_to_vmem [thread:$0]  %s186_s1, 256, %s20_s20, [#allocation5]  }
  0x1d   :  { %127 = dma.done.wait [#allocation5], 256  }
  0x1e   :  { %128 = vsyncadd [#allocation5], 4294967040  ;;  %s26_s30 = sld [smem:[#allocation3]]  ;;  %s63_s3 = sld [smem:[#allocation3 + $0x1]]  ;;  %v30_v0 = vld [vmem:[#allocation4] sm:$0xff]  ;;  %v31_v2 = vld [vmem:[#allocation4 + $0x8] sm:$0xff] }
  0x1f   :  { %s64_s4 = sld [smem:[#allocation3 + $0x2]]  ;;  %s65_s5 = sld [smem:[#allocation3 + $0x3]] }
  0x20   :  { %s133_s6 = smov [#allocation7]  }
  0x21   :  { %s54_s1 = sshll.u32 %s133_s6, 4  ;;  %s55_s1 = int_to_ptr.vmem [resolvable:$true] %s54_s1 }
  0x22   :  { %s103_s7 = scalar_lea.vmem %s55_s1, 256  ;;  %p108_p12 = scmp.lt.s32.totalorder %s55_s1, %s55_s1 }
  0x23   :  { %p104_p11 = scmp.ne.s32.totalorder %s55_s1, %s103_s7  ;;  %p109_p13 = scmp.lt.s32.totalorder %s103_s7, %s103_s7 }
  0x24   :  { %v32_v1 = vstv %s26_s30  ;;  %v37_v5 = vstv %s63_s3 }
  0x25   :  { %v33_v3 = vmul.f32 %v32_v1, %v30_v0  ;;  %v34_v4 = vmul.f32 %v32_v1, %v31_v2  ;;  %v40_v8 = vstv %s64_s4  ;;  %v43_v11 = vstv %s65_s5  ;;  %p110_p0 = por %p109_p13, %p108_p12 }
  0x27   :  { %v66_v6 = vround.rtne.f32 %v33_v3  ;;  %v67_v7 = vround.rtne.f32 %v34_v4  ;;  %p111_p1 = pnand %p110_p0, %p104_p11 }
  0x29   :  { %v38_v9 = vadd.f32 %v66_v6, %v37_v5  ;;  %v39_v10 = vadd.f32 %v67_v7, %v37_v5 }
  0x2b   :  { %v41_v12 = vmax.f32 %v40_v8, %v38_v9  ;;  %v42_v13 = vmax.f32 %v40_v8, %v39_v10 }
  0x2d   :  { %v44_v14 = vmin.f32 %v43_v11, %v41_v12  ;;  %v45_v15 = vmin.f32 %v43_v11, %v42_v13 }
  0x2f   :  { %46 = vst [vmem:[#allocation7] sm:$0xff] %v44_v14  ;;  %47 = vst [vmem:[#allocation7 + $0x8] sm:$0xff] %v45_v15 }
  0x30   :  { %114 = shalt.err (!%p111_p1)
}
  0x31   :  { %s115_s10 = scalar_lea.hbm %s187_s2, 256 }
  0x32   :  { %p116_p2 = scmp.ne.s32.totalorder %s187_s2, %s115_s10  ;;  %p119_p3 = scmp.lt.u32.totalorder %s115_s10, %s187_s2 }
  0x34   :  { %p121_p4 = pnand %p119_p3, %p116_p2 }
  0x36   :  { %124 = shalt.err (!%p121_p4)
}
  0x37   :  { %57 = dma.vmem_to_hbm [thread:$0]  %s55_s1, 256, %s187_s2, [#allocation6]  }
  0x38   :  { %129 = dma.done.wait [#allocation6], 256  }
  0x39   :  { %130 = vsyncadd [#allocation6], 4294967040 }
  0x3a   :  { %61 = vsyncpa [#allocation5], 1 }
  0x3b   :  { %62 = vsyncpa [#allocation6], 1 }

</bundles_post_ra>
